<compile_context>
chip_gen: v7x
topology: tpu7x:2x2x1
jax: 0.10.0
libtpu: 0.0.40
codegen_flags: <defaults>
</compile_context>

<pallas_src>
import math

import jax
import jax.numpy as jnp
from jax import lax
from jax.experimental import pallas as pl
from jax.experimental.pallas import tpu as pltpu


def _round_up(v, m):
    return (v + m - 1) // m * m


def _pad2d(a, rows, cols):
    pr = rows - a.shape[0]
    pc = cols - a.shape[1]
    if pr or pc:
        a = jnp.pad(a, ((0, pr), (0, pc)))
    return a


def _lora_kernel(x_ref, w_ref, z_ref, wout_ref, b_ref, o_ref, acc_ref):
    """One (tm, tn) output tile at K-step k.

    x_ref:    (tm, tk)      activation tile (compute dtype)
    w_ref:    (tn, tk)      base weight tile, original (N, K) layout
    z_ref:    (tm, r_pad)   precomputed LoRA down-projection x @ W_in^T
    wout_ref: (tn, r_pad)   LoRA up-projection weight, original (N, r) layout
    b_ref:    (1, tn) f32 or None
    o_ref:    (tm, tn)      output tile
    acc_ref:  (tm, tn) f32  accumulator carried across the K axis only
    """
    k = pl.program_id(2)

    @pl.when(k == 0)
    def _():
        acc_ref[...] = jnp.zeros_like(acc_ref)

    # Base path: contract the last (K) dims directly -> no weight transpose.
    acc_ref[...] += lax.dot_general(
        x_ref[...], w_ref[...],
        dimension_numbers=(((1,), (1,)), ((), ())),
        preferred_element_type=jnp.float32)

    # Finalize at the last K step: LoRA up-projection + bias + store.
    @pl.when(k == pl.num_programs(2) - 1)
    def _():
        out = acc_ref[...] + lax.dot_general(
            z_ref[...], wout_ref[...],
            dimension_numbers=(((1,), (1,)), ((), ())),
            preferred_element_type=jnp.float32)
        if b_ref is not None:
            out = out + b_ref[...].astype(jnp.float32)
        o_ref[...] = out.astype(o_ref.dtype)


def _lora_kernel_bias(x_ref, w_ref, z_ref, wout_ref, b_ref, o_ref, acc_ref):
    _lora_kernel(x_ref, w_ref, z_ref, wout_ref, b_ref, o_ref, acc_ref)


def _lora_kernel_nobias(x_ref, w_ref, z_ref, wout_ref, o_ref, acc_ref):
    _lora_kernel(x_ref, w_ref, z_ref, wout_ref, None, o_ref, acc_ref)


def lora_linear(x, weight, bias, weight_in, weight_out, *,
                tm=512, tn=1024, tk=1024, compute_dtype=jnp.bfloat16):
    """Pallas LoRALinear forward.

    x:          (..., in_features)
    weight:     (out_features, in_features)   -- frozen base weight (N, K)
    bias:       (out_features,) or None       -- frozen base bias
    weight_in:  (rank, in_features)           -- LoRA down projection
    weight_out: (out_features, rank)          -- LoRA up projection
    compute_dtype: MXU operand dtype (default bf16).  Accumulation is f32 and
        the output keeps x.dtype.  For best performance, pass weights already
        in compute_dtype so the casts below are no-ops.
    """
    out_features, in_features = weight.shape
    rank = weight_in.shape[0]
    lead_shape = x.shape[:-1]
    M = int(math.prod(lead_shape)) if lead_shape else 1
    out_dtype = x.dtype

    # Align requested tiles to the (8, 128) vreg grid, then cap by the padded
    # problem dims so small shapes do not pay for oversized tiles.
    tm = _round_up(max(tm, 8), 8)
    tn = _round_up(max(tn, 128), 128)
    tk = _round_up(max(tk, 128), 128)
    tm_eff = min(tm, _round_up(M, 8))
    tn_eff = min(tn, _round_up(out_features, 128))
    tk_eff = min(tk, _round_up(in_features, 128))
    Mp = _round_up(M, tm_eff)
    Np = _round_up(out_features, tn_eff)
    Kp = _round_up(in_features, tk_eff)
    r_pad = _round_up(rank, 128)    # lane-dense LoRA operands

    cdt = jnp.dtype(compute_dtype)
    odt = jnp.dtype(out_dtype)

    # Activations: cast + pad (small compared with the weight stream).
    x2 = x.reshape(M, in_features).astype(compute_dtype)
    x_p = _pad2d(x2, Mp, Kp)

    # Frozen weights: NO transpose; cast is a no-op if caller pre-casts;
    # padding only triggers for non-tile-aligned feature dims.
    w_p = _pad2d(weight.astype(compute_dtype), Np, Kp)              # (Np, Kp)
    wout_p = _pad2d(weight_out.astype(compute_dtype), Np, r_pad)    # (Np, r_pad)

    # LoRA down-projection z = x @ W_in^T: M x rank, trivial FLOPs -> wrapper.
    # (Keeps the N grid axis parallel and the rank-wide MXU pass out of the
    #  hot K loop.  Down-cast to compute_dtype before the up-projection, same
    #  numerics note as the reference bf16 path.)
    z = lax.dot_general(x2, weight_in.astype(compute_dtype),
                        dimension_numbers=(((1,), (1,)), ((), ())),
                        preferred_element_type=jnp.float32)
    z_p = _pad2d(z.astype(compute_dtype), Mp, r_pad)                # (Mp, r_pad)

    grid = (Mp // tm_eff, Np // tn_eff, Kp // tk_eff)

    in_specs = [
        pl.BlockSpec((tm_eff, tk_eff), lambda i, j, k: (i, k)),     # x
        pl.BlockSpec((tn_eff, tk_eff), lambda i, j, k: (j, k)),     # W (N, K)
        pl.BlockSpec((tm_eff, r_pad), lambda i, j, k: (i, 0)),      # z
        pl.BlockSpec((tn_eff, r_pad), lambda i, j, k: (j, 0)),      # W_out
    ]
    operands = [x_p, w_p, z_p, wout_p]
    if bias is not None:
        b2d = _pad2d(bias.reshape(1, out_features).astype(jnp.float32), 1, Np)
        in_specs.append(pl.BlockSpec((1, tn_eff), lambda i, j, k: (0, j)))
        operands.append(b2d)
        kernel = _lora_kernel_bias
    else:
        kernel = _lora_kernel_nobias

    # Per-block VMEM footprint (double-buffered inputs/outputs + f32 acc);
    # set the scoped VMEM limit explicitly (v5e default is only 16 MiB).
    blk_bytes = (
        2 * tm_eff * tk_eff * cdt.itemsize          # x
        + 2 * tn_eff * tk_eff * cdt.itemsize        # W
        + 2 * tm_eff * r_pad * cdt.itemsize         # z
        + 2 * tn_eff * r_pad * cdt.itemsize         # W_out
        + 2 * 8 * tn_eff * 4                        # bias (sublane-padded)
        + 2 * tm_eff * tn_eff * odt.itemsize        # output
        + tm_eff * tn_eff * 4)                      # accumulator scratch
    vmem_limit = max(32 * 1024 * 1024, int(blk_bytes * 5 // 4))

    flops = 2 * M * out_features * in_features + 2 * M * out_features * rank
    bytes_accessed = (
        M * in_features * cdt.itemsize
        + out_features * in_features * cdt.itemsize
        + M * rank * cdt.itemsize
        + out_features * rank * cdt.itemsize
        + (out_features * 4 if bias is not None else 0)
        + M * out_features * odt.itemsize)

    out_p = pl.pallas_call(
        kernel,
        out_shape=jax.ShapeDtypeStruct((Mp, Np), out_dtype),
        grid_spec=pltpu.PrefetchScalarGridSpec(
            num_scalar_prefetch=0,
            grid=grid,
            in_specs=in_specs,
            out_specs=pl.BlockSpec((tm_eff, tn_eff), lambda i, j, k: (i, j)),
            scratch_shapes=[
                pltpu.VMEM((tm_eff, tn_eff), jnp.float32),  # base accumulator
            ],
        ),
        compiler_params=pltpu.CompilerParams(
            # i, j: independent output tiles -> megacore-shardable (v7x).
            # k:    reduction axis (accumulator carried across K steps).
            dimension_semantics=("parallel", "parallel", "arbitrary"),
            vmem_limit_bytes=vmem_limit),
        cost_estimate=pl.CostEstimate(flops=flops, transcendentals=0,
                                      bytes_accessed=bytes_accessed),
    )(*operands)

    out2d = out_p[:M, :out_features]
    return out2d.reshape(*lead_shape, out_features)


if __name__ == "__main__":
    key = jax.random.PRNGKey(0)
    ks = jax.random.split(key, 12)
    dtype = jnp.float32

    # ---- Case 1: bias, nonzero LoRA up-projection, default bf16 compute ----
    batch, seq = 2, 8
    in_f, out_f, rank = 32, 64, 8
    std = 1.0 / math.sqrt(rank)
    weight = jax.random.normal(ks[0], (out_f, in_f), dtype) * 0.1
    bias = jax.random.normal(ks[1], (out_f,), dtype) * 0.1
    weight_in = jax.random.normal(ks[2], (rank, in_f), dtype) * std
    # LoRALinear._reset_parameters zero-inits weight_out; use a nonzero value
    # here so the LoRA up-projection path is actually validated numerically.
    weight_out = jax.random.normal(ks[3], (out_f, rank), dtype) * 0.05
    x = jax.random.normal(ks[4], (batch, seq, in_f), dtype)
    ref = (x @ weight.T + bias) + (x @ weight_in.T) @ weight_out.T

    out_bf16 = jax.block_until_ready(
        lora_linear(x, weight, bias, weight_in, weight_out))
    assert out_bf16.shape == (batch, seq, out_f)
    assert jnp.allclose(out_bf16, ref, atol=5e-2, rtol=5e-2), "bf16 mismatch"

    # ---- Case 2: explicit f32 compute (strict numerics) ----
    out_f32 = jax.block_until_ready(
        lora_linear(x, weight, bias, weight_in, weight_out,
                    compute_dtype=jnp.float32))
    assert jnp.allclose(out_f32, ref, atol=1e-5, rtol=1e-5), "f32+bias mismatch"

    # ---- Case 3: bias=None, non-tile-aligned shapes (exercise padding) ----
    b2, s2, in2, out2, r2 = 3, 5, 48, 40, 8
    w2 = jax.random.normal(ks[5], (out2, in2), dtype) * 0.1
    win2 = jax.random.normal(ks[6], (r2, in2), dtype) / math.sqrt(r2)
    wout2 = jax.random.normal(ks[7], (out2, r2), dtype) * 0.05
    x2 = jax.random.normal(ks[8], (b2, s2, in2), dtype)
    out_nb = jax.block_until_ready(
        lora_linear(x2, w2, None, win2, wout2, compute_dtype=jnp.float32))
    ref_nb = (x2 @ w2.T) + (x2 @ win2.T) @ wout2.T
    assert out_nb.shape == (b2, s2, out2)
    assert jnp.allclose(out_nb, ref_nb, atol=1e-5, rtol=1e-5), "no-bias mismatch"

    # ---- Case 4: multi-tile grid (2x2x2) with K accumulation, f32 ----
    in3, out3, r3 = 256, 256, 8
    w3 = jax.random.normal(ks[9], (out3, in3), dtype) * 0.05
    b3 = jax.random.normal(ks[10], (out3,), dtype) * 0.1
    win3 = jax.random.normal(ks[11], (r3, in3), dtype) / math.sqrt(r3)
    wout3 = jax.random.normal(ks[3], (out3, r3), dtype) * 0.05
    x3 = jax.random.normal(ks[4], (2, 8, in3), dtype)
    out_mt = jax.block_until_ready(
        lora_linear(x3, w3, b3, win3, wout3,
                    tm=8, tn=128, tk=128, compute_dtype=jnp.float32))
    ref_mt = (x3 @ w3.T + b3) + (x3 @ win3.T) @ wout3.T
    assert jnp.allclose(out_mt, ref_mt, atol=1e-4, rtol=1e-4), "multi-tile mismatch"

    print("KERNEL_OK")
</pallas_src>

<mosaic_0001>
module attributes {stable_mosaic.version = 11 : i64} {
  func.func @_lora_kernel_bias(%arg0: i32, %arg1: i32, %arg2: i32, %arg3: memref<16x128xbf16, #tpu.memory_space<vmem>>, %arg4: memref<128x128xbf16, #tpu.memory_space<vmem>>, %arg5: memref<16x128xbf16, #tpu.memory_space<vmem>>, %arg6: memref<128x128xbf16, #tpu.memory_space<vmem>>, %arg7: memref<1x128xf32, #tpu.memory_space<vmem>>, %arg8: memref<16x128xf32, #tpu.memory_space<vmem>>, %arg9: memref<16x128xf32, #tpu.memory_space<vmem>>) attributes {dimension_semantics = [#tpu.dimension_semantics<parallel>, #tpu.dimension_semantics<parallel>, #tpu.dimension_semantics<arbitrary>], iteration_bounds = array<i64: 1, 1, 1>, scalar_prefetch = 0 : i64, scratch_operands = 1 : i64, tpu.core_type = #tpu.core_type<tc>, window_params = [{transform_indices = @transform_0, window_bounds = array<i64: 16, 128>}, {transform_indices = @transform_1, window_bounds = array<i64: 128, 128>}, {transform_indices = @transform_2, window_bounds = array<i64: 16, 128>}, {transform_indices = @transform_3, window_bounds = array<i64: 128, 128>}, {transform_indices = @transform_4, window_bounds = array<i64: 1, 128>}, {transform_indices = @transform_5, window_bounds = array<i64: 16, 128>}]} {
    %c0_i32 = arith.constant 0 : i32
    %0 = arith.cmpi eq, %arg2, %c0_i32 : i32
    %1 = arith.extui %0 : i1 to i32
    %c0_i32_0 = arith.constant 0 : i32
    %2 = arith.cmpi ne, %1, %c0_i32_0 : i32
    scf.if %2 {
      %cst_10 = arith.constant 0.000000e+00 : f32
      %12 = vector.broadcast %cst_10 : f32 to vector<16x128xf32>
      %c0_11 = arith.constant 0 : index
      %c0_12 = arith.constant 0 : index
      %13 = vector.load %arg9[%c0_11, %c0_12] : memref<16x128xf32, #tpu.memory_space<vmem>>, vector<16x128xf32>
      tpu.vector_store %arg9[%c0_11, %c0_12], %12 {strides = array<i32>} : memref<16x128xf32, #tpu.memory_space<vmem>>, vector<16x128xf32>,
    } else {
    }
    %c0 = arith.constant 0 : index
    %c0_1 = arith.constant 0 : index
    %3 = vector.load %arg9[%c0, %c0_1] : memref<16x128xf32, #tpu.memory_space<vmem>>, vector<16x128xf32>
    %c0_2 = arith.constant 0 : index
    %c0_3 = arith.constant 0 : index
    %4 = vector.load %arg3[%c0_2, %c0_3] : memref<16x128xbf16, #tpu.memory_space<vmem>>, vector<16x128xbf16>
    %c0_4 = arith.constant 0 : index
    %c0_5 = arith.constant 0 : index
    %5 = vector.load %arg4[%c0_4, %c0_5] : memref<128x128xbf16, #tpu.memory_space<vmem>>, vector<128x128xbf16>
    %cst = arith.constant dense<0.000000e+00> : vector<16x128xf32>
    %6 = tpu.matmul %4, %5, %cst {dimension_numbers = #tpu.dot_dimension_numbers<[1], [1], [0], [0], [0, 0, 1, 0], [], []>} : vector<16x128xbf16>, vector<128x128xbf16>, vector<16x128xf32> -> vector<16x128xf32>
    %7 = arith.addf %3, %6 : vector<16x128xf32>
    %c0_6 = arith.constant 0 : index
    %c0_7 = arith.constant 0 : index
    %8 = vector.load %arg9[%c0_6, %c0_7] : memref<16x128xf32, #tpu.memory_space<vmem>>, vector<16x128xf32>
    tpu.vector_store %arg9[%c0_6, %c0_7], %7 {strides = array<i32>} : memref<16x128xf32, #tpu.memory_space<vmem>>, vector<16x128xf32>,
    %c0_i32_8 = arith.constant 0 : i32
    %9 = arith.cmpi eq, %arg2, %c0_i32_8 : i32
    %10 = arith.extui %9 : i1 to i32
    %c0_i32_9 = arith.constant 0 : i32
    %11 = arith.cmpi ne, %10, %c0_i32_9 : i32
    scf.if %11 {
      %c0_10 = arith.constant 0 : index
      %c0_11 = arith.constant 0 : index
      %12 = vector.load %arg9[%c0_10, %c0_11] : memref<16x128xf32, #tpu.memory_space<vmem>>, vector<16x128xf32>
      %c0_12 = arith.constant 0 : index
      %c0_13 = arith.constant 0 : index
      %13 = vector.load %arg5[%c0_12, %c0_13] : memref<16x128xbf16, #tpu.memory_space<vmem>>, vector<16x128xbf16>
      %c0_14 = arith.constant 0 : index
      %c0_15 = arith.constant 0 : index
      %14 = vector.load %arg6[%c0_14, %c0_15] : memref<128x128xbf16, #tpu.memory_space<vmem>>, vector<128x128xbf16>
      %cst_16 = arith.constant dense<0.000000e+00> : vector<16x128xf32>
      %15 = tpu.matmul %13, %14, %cst_16 {dimension_numbers = #tpu.dot_dimension_numbers<[1], [1], [0], [0], [0, 0, 1, 0], [], []>} : vector<16x128xbf16>, vector<128x128xbf16>, vector<16x128xf32> -> vector<16x128xf32>
      %16 = arith.addf %12, %15 : vector<16x128xf32>
      %c0_17 = arith.constant 0 : index
      %c0_18 = arith.constant 0 : index
      %17 = vector.load %arg7[%c0_17, %c0_18] : memref<1x128xf32, #tpu.memory_space<vmem>>, vector<1x128xf32>
      %18 = vector.broadcast %17 : vector<1x128xf32> to vector<16x128xf32>
      %19 = arith.addf %16, %18 : vector<16x128xf32>
      %c0_19 = arith.constant 0 : index
      %c0_20 = arith.constant 0 : index
      %20 = vector.load %arg8[%c0_19, %c0_20] : memref<16x128xf32, #tpu.memory_space<vmem>>, vector<16x128xf32>
      tpu.vector_store %arg8[%c0_19, %c0_20], %19 {strides = array<i32>} : memref<16x128xf32, #tpu.memory_space<vmem>>, vector<16x128xf32>,
    } else {
    }
    return
  }
  func.func @transform_0(%arg0: i32, %arg1: i32, %arg2: i32) -> (i32, i32) {
    %c0_i32 = arith.constant 0 : i32
    return %arg0, %arg2 : i32, i32
  }
  func.func @transform_1(%arg0: i32, %arg1: i32, %arg2: i32) -> (i32, i32) {
    %c0_i32 = arith.constant 0 : i32
    return %arg1, %arg2 : i32, i32
  }
  func.func @transform_2(%arg0: i32, %arg1: i32, %arg2: i32) -> (i32, i32) {
    %c0_i32 = arith.constant 0 : i32
    %c0_i32_0 = arith.constant 0 : i32
    return %arg0, %c0_i32 : i32, i32
  }
  func.func @transform_3(%arg0: i32, %arg1: i32, %arg2: i32) -> (i32, i32) {
    %c0_i32 = arith.constant 0 : i32
    %c0_i32_0 = arith.constant 0 : i32
    return %arg1, %c0_i32 : i32, i32
  }
  func.func @transform_4(%arg0: i32, %arg1: i32, %arg2: i32) -> (i32, i32) {
    %c0_i32 = arith.constant 0 : i32
    %c0_i32_0 = arith.constant 0 : i32
    return %c0_i32, %arg1 : i32, i32
  }
  func.func @transform_5(%arg0: i32, %arg1: i32, %arg2: i32) -> (i32, i32) {
    %c0_i32 = arith.constant 0 : i32
    return %arg0, %arg1 : i32, i32
  }
}

</mosaic_0001>

<bundles_post_ra>
// kernel: tpu_custom_call.1
= control target key start
LH: loop header
LB: loop body
LE: loop exit
PB: predicated region body
PF: predicated region fallthrough
CT: control target
= control target key end

     0   :  { %10 = vsyncpa [#allocation4], 0  ;;  %s706_s0 = inlined_call_operand.hbm [shape: bf16[16,128], index: 0, kind: input, shape index: {}]   ;;  %s707_s1 = inlined_call_operand.hbm [shape: bf16[128,128], index: 1, kind: input, shape index: {}]   ;;  %s708_s2 = inlined_call_operand.hbm [shape: bf16[16,128], index: 2, kind: input, shape index: {}]   ;;  %s709_s3 = inlined_call_operand.hbm [shape: bf16[128,128], index: 3, kind: input, shape index: {}]   ;;  %s710_s4 = inlined_call_operand.vmem [shape: f32[1,128], index: 4, kind: input, shape index: {}]   ;;  %s711_s5 = inlined_call_operand.hbm [shape: f32[16,128], index: 5, kind: output, shape index: {}]  }
   0x1   :  { %11 = vsyncpa [#allocation7], 0 }
   0x2   :  { %12 = vsyncpa [#allocation10], 0 }
   0x3   :  { %13 = vsyncpa [#allocation5], 0  ;;  %s576_s18 = smov [#allocation6]   ;;  %s577_s20 = smov [#allocation3]  }
   0x4   :  { %s31_s19 = sshll.u32 %s576_s18, 4  ;;  %s19_s21 = sshll.u32 %s577_s20, 4  ;;  %s32_s19 = int_to_ptr.vmem [resolvable:$true] %s31_s19  ;;  %s617_s21 = int_to_ptr.vmem [resolvable:$true] %s19_s21 }
   0x5   :  { %s458_s24 = scalar_lea.hbm %s707_s1, 1024 }
   0x6   :  { %p459_p0 = scmp.ne.s32.totalorder %s707_s1, %s458_s24  ;;  %p462_p1 = scmp.lt.u32.totalorder %s458_s24, %s707_s1 }
   0x8   :  { %p464_p2 = pnand %p462_p1, %p459_p0 }
   0xa   :  { %467 = shalt.err (!%p464_p2)
}
   0xb   :  { %s468_s29 = scalar_lea.vmem %s32_s19, 1024  ;;  %p473_p4 = scmp.lt.s32.totalorder %s32_s19, %s32_s19 }
   0xc   :  { %p469_p3 = scmp.ne.s32.totalorder %s32_s19, %s468_s29  ;;  %p474_p5 = scmp.lt.s32.totalorder %s468_s29, %s468_s29 }
   0xe   :  { %p475_p6 = por %p474_p5, %p473_p4 }
  0x10   :  { %p476_p7 = pnand %p475_p6, %p469_p3 }
  0x12   :  { %479 = shalt.err (!%p476_p7)
}
  0x13   :  { %s578_s30 = smov 64   ;;  %s579_s6 = smov 4  }
  0x14   :  { %37 = dma.hbm_to_vmem [thread:$0]  %s707_s1, 1024, %s32_s19, [#allocation7], %s578_s30, %s578_s30, %s579_s6  }
  0x15   :  { %s480_s11 = scalar_lea.hbm %s706_s0, 128 }
  0x16   :  { %p481_p8 = scmp.ne.s32.totalorder %s706_s0, %s480_s11  ;;  %p484_p9 = scmp.lt.u32.totalorder %s480_s11, %s706_s0 }
  0x18   :  { %p486_p10 = pnand %p484_p9, %p481_p8 }
  0x1a   :  { %489 = shalt.err (!%p486_p10)
}
  0x1b   :  { %s490_s16 = scalar_lea.vmem %s617_s21, 128  ;;  %p495_p12 = scmp.lt.s32.totalorder %s617_s21, %s617_s21 }
  0x1c   :  { %p491_p11 = scmp.ne.s32.totalorder %s617_s21, %s490_s16  ;;  %p496_p13 = scmp.lt.s32.totalorder %s490_s16, %s490_s16 }
  0x1e   :  { %p497_p0 = por %p496_p13, %p495_p12 }
  0x20   :  { %p498_p1 = pnand %p497_p0, %p491_p11 }
  0x22   :  { %501 = shalt.err (!%p498_p1)
}
  0x23   :  { %25 = dma.hbm_to_vmem [thread:$0]  %s706_s0, 128, %s617_s21, [#allocation4], %s578_s30, %s578_s30, %s579_s6  }
  0x24   :  { %s580_s18 = smov [#allocation8]   ;;  %s581_s20 = smov [#allocation9]  }
  0x25   :  { %s43_s19 = sshll.u32 %s580_s18, 4  ;;  %s55_s22 = sshll.u32 %s581_s20, 4  ;;  %s44_s19 = int_to_ptr.vmem [resolvable:$true] %s43_s19  ;;  %s654_s22 = int_to_ptr.vmem [resolvable:$true] %s55_s22 }
  0x26   :  { %s502_s25 = scalar_lea.hbm %s708_s2, 128 }
  0x27   :  { %p503_p2 = scmp.ne.s32.totalorder %s708_s2, %s502_s25  ;;  %p506_p3 = scmp.lt.u32.totalorder %s502_s25, %s708_s2 }
  0x29   :  { %p508_p4 = pnand %p506_p3, %p503_p2 }
  0x2b   :  { %511 = shalt.err (!%p508_p4)
}
  0x2c   :  { %s512_s0 = scalar_lea.vmem %s44_s19, 128  ;;  %p517_p6 = scmp.lt.s32.totalorder %s44_s19, %s44_s19 }
  0x2d   :  { %p513_p5 = scmp.ne.s32.totalorder %s44_s19, %s512_s0  ;;  %p518_p7 = scmp.lt.s32.totalorder %s512_s0, %s512_s0 }
  0x2f   :  { %p519_p8 = por %p518_p7, %p517_p6 }
  0x31   :  { %p520_p9 = pnand %p519_p8, %p513_p5 }
  0x33   :  { %523 = shalt.err (!%p520_p9)
}
  0x34   :  { %49 = dma.hbm_to_vmem [thread:$0]  %s708_s2, 128, %s44_s19, [#allocation7], %s578_s30, %s578_s30, %s579_s6  }
  0x35   :  { %s524_s10 = scalar_lea.hbm %s709_s3, 1024 }
  0x36   :  { %p525_p10 = scmp.ne.s32.totalorder %s709_s3, %s524_s10  ;;  %p528_p11 = scmp.lt.u32.totalorder %s524_s10, %s709_s3 }
  0x38   :  { %p530_p12 = pnand %p528_p11, %p525_p10 }
  0x3a   :  { %533 = shalt.err (!%p530_p12)
}
  0x3b   :  { %s534_s15 = scalar_lea.vmem %s654_s22, 1024  ;;  %p539_p0 = scmp.lt.s32.totalorder %s654_s22, %s654_s22 }
  0x3c   :  { %p535_p13 = scmp.ne.s32.totalorder %s654_s22, %s534_s15  ;;  %p540_p1 = scmp.lt.s32.totalorder %s534_s15, %s534_s15 }
  0x3e   :  { %p541_p2 = por %p540_p1, %p539_p0 }
  0x40   :  { %p542_p3 = pnand %p541_p2, %p535_p13 }
  0x42   :  { %545 = shalt.err (!%p542_p3)
}
  0x43   :  { %61 = dma.hbm_to_vmem [thread:$0]  %s709_s3, 1024, %s654_s22, [#allocation10], %s578_s30, %s578_s30, %s579_s6  }
  0x44   :  { %568 = dma.done.wait [#allocation4], 128  }
  0x45   :  { %569 = vsyncadd [#allocation4], 4294967168 }
  0x46   :  { %570 = dma.done.wait [#allocation7], 1152  }
  0x47   :  { %571 = vsyncadd [#allocation7], 4294966144 }
  0x48   :  { %572 = dma.done.wait [#allocation10], 1024  }
  0x49   :  { %573 = vsyncadd [#allocation10], 4294966272  ;;  %v582_v0 = vmov 0.0   ;;  %vm583_vm0 = vmmov 0   ;;  %v440_v1 = vld [vmem:[#allocation6] sm:$0xff]   ;;  %v441_v2 = vld [vmem:[#allocation9] sm:$0xff]  }
  0x4a   :  { %389 = vmatprep.subr.bf16.mxu0 %v582_v0  ;;  %409 = vmatprep.subr.bf16.mxu1 %v582_v0  ;;  %v442_v3 = vld [vmem:[#allocation6 + $0x8] sm:$0xff]   ;;  %v443_v4 = vld [vmem:[#allocation9 + $0x8] sm:$0xff]   ;;  %v445_v6 = vld [vmem:[#allocation9 + $0x10] sm:$0xff]   ;;  %s584_s6 = smov [#allocation11]  }
  0x4b   :  { %405 = vmatprep.mubr.msk.bf16.mxu0 %vm583_vm0, %v582_v0  ;;  %425 = vmatprep.mubr.msk.bf16.mxu1 %vm583_vm0, %v582_v0  ;;  %v444_v5 = vld [vmem:[#allocation6 + $0x10] sm:$0xff]   ;;  %v446_v7 = vld [vmem:[#allocation6 + $0x18] sm:$0xff]   ;;  %v447_v8 = vld [vmem:[#allocation9 + $0x18] sm:$0xff]   ;;  %s338_s1 = sshll.u32 %s584_s6, 4  ;;  %s339_s1 = int_to_ptr.vmem [resolvable:$true] %s338_s1 }
  0x4c   :  { %390 = vmatpush3.bf16.xpose.msra.mxu0 %v440_v1  ;;  %410 = vmatpush3.bf16.xpose.msra.mxu1 %v441_v2  ;;  %v448_v9 = vld [vmem:[#allocation6 + $0x20] sm:$0xff]   ;;  %v449_v10 = vld [vmem:[#allocation9 + $0x20] sm:$0xff]   ;;  %v451_v12 = vld [vmem:[#allocation9 + $0x28] sm:$0xff]   ;;  %s546_s17 = scalar_lea.vmem %s339_s1, 256  ;;  %p551_p5 = scmp.lt.s32.totalorder %s339_s1, %s339_s1 }
  0x4d   :  { %391 = vmatprep.subr.bf16.mxu0 %v582_v0  ;;  %411 = vmatprep.subr.bf16.mxu1 %v582_v0  ;;  %v450_v11 = vld [vmem:[#allocation6 + $0x28] sm:$0xff]   ;;  %v452_v13 = vld [vmem:[#allocation6 + $0x30] sm:$0xff]   ;;  %v453_v14 = vld [vmem:[#allocation9 + $0x30] sm:$0xff]   ;;  %p547_p4 = scmp.ne.s32.totalorder %s339_s1, %s546_s17  ;;  %p552_p6 = scmp.lt.s32.totalorder %s546_s17, %s546_s17 }
  0x4e   :  { %v454_v15 = vld [vmem:[#allocation6 + $0x38] sm:$0xff]   ;;  %v455_v16 = vld [vmem:[#allocation9 + $0x38] sm:$0xff]  }
  0x4f   :  { %v456_v17 = vld [vmem:[#allocation3] sm:$0xff]   ;;  %v457_v18 = vld [vmem:[#allocation8] sm:$0xff]   ;;  %p553_p7 = por %p552_p6, %p551_p5 }
  0x50   :  { %v370_v21 = vld [vmem:[%s710_s4] ss:$0 sm:$0xff] }
  0x51   :  { %p554_p8 = pnand %p553_p7, %p547_p4 }
  0x54   :  { %392 = vmatpush3.bf16.xpose.msra.mxu0 %v442_v3  ;;  %412 = vmatpush3.bf16.xpose.msra.mxu1 %v443_v4 }
  0x55   :  { %393 = vmatprep.subr.bf16.mxu0 %v582_v0  ;;  %413 = vmatprep.subr.bf16.mxu1 %v582_v0 }
  0x5c   :  { %394 = vmatpush3.bf16.xpose.msra.mxu0 %v444_v5  ;;  %414 = vmatpush3.bf16.xpose.msra.mxu1 %v445_v6 }
  0x5d   :  { %395 = vmatprep.subr.bf16.mxu0 %v582_v0  ;;  %415 = vmatprep.subr.bf16.mxu1 %v582_v0 }
  0x64   :  { %396 = vmatpush3.bf16.xpose.msra.mxu0 %v446_v7  ;;  %416 = vmatpush3.bf16.xpose.msra.mxu1 %v447_v8 }
  0x65   :  { %397 = vmatprep.subr.bf16.mxu0 %v582_v0  ;;  %417 = vmatprep.subr.bf16.mxu1 %v582_v0 }
  0x6c   :  { %398 = vmatpush3.bf16.xpose.msra.mxu0 %v448_v9  ;;  %418 = vmatpush3.bf16.xpose.msra.mxu1 %v449_v10 }
  0x6d   :  { %399 = vmatprep.subr.bf16.mxu0 %v582_v0  ;;  %419 = vmatprep.subr.bf16.mxu1 %v582_v0 }
  0x74   :  { %400 = vmatpush3.bf16.xpose.msra.mxu0 %v450_v11  ;;  %420 = vmatpush3.bf16.xpose.msra.mxu1 %v451_v12 }
  0x75   :  { %401 = vmatprep.subr.bf16.mxu0 %v582_v0  ;;  %421 = vmatprep.subr.bf16.mxu1 %v582_v0 }
  0x7c   :  { %402 = vmatpush3.bf16.xpose.msra.mxu0 %v452_v13  ;;  %422 = vmatpush3.bf16.xpose.msra.mxu1 %v453_v14 }
  0x7d   :  { %403 = vmatprep.subr.bf16.mxu0 %v582_v0  ;;  %423 = vmatprep.subr.bf16.mxu1 %v582_v0 }
  0x84   :  { %404 = vmatpush3.bf16.xpose.msra.mxu0 %v454_v15  ;;  %424 = vmatpush3.bf16.xpose.msra.mxu1 %v455_v16 }
  0x8b   :  { %406 = vmatmul.mubr.bf16.vlgmr.msra.gmra.mrb[0].mxu0 %v456_v17  ;;  %426 = vmatmul.mubr.bf16.vlgmr.msra.gmra.mrb[0].mxu1 %v457_v18 }
 0x15e   :  { %v191_v19 = vpop.f32.mrb[0].mxu0  ;;  %v313_v20 = vpop.f32.mrb[0].mxu1 }
 0x15f   :  { %v407_v22 = vpop.f32.mrb[1].mxu0  ;;  %v320_v23 = vadd.f32 %v313_v20, %v191_v19  ;;  %v427_v24 = vpop.f32.mrb[1].mxu1 }
 0x160   :  { %v194_v25 = vpop.f32.mrb[2].mxu0  ;;  %v316_v26 = vpop.f32.mrb[2].mxu1 }
 0x161   :  { %v408_v27 = vpop.f32.mrb[3].mxu0  ;;  %v329_v28 = vadd.f32 %v370_v21, %v320_v23  ;;  %v321_v29 = vadd.f32 %v316_v26, %v194_v25  ;;  %v428_v30 = vpop.f32.mrb[3].mxu1 }
 0x163   :  { %331 = vst [vmem:[#allocation11] sm:$0xff] %v329_v28  ;;  %v330_v31 = vadd.f32 %v370_v21, %v321_v29 }
 0x165   :  { %332 = vst [vmem:[#allocation11 + $0x8] sm:$0xff] %v330_v31 }
 0x166   :  { %557 = shalt.err (!%p554_p8)
}
 0x167   :  { %s558_s19 = scalar_lea.hbm %s711_s5, 256 }
 0x168   :  { %p559_p9 = scmp.ne.s32.totalorder %s711_s5, %s558_s19  ;;  %p562_p10 = scmp.lt.u32.totalorder %s558_s19, %s711_s5 }
 0x16a   :  { %p564_p11 = pnand %p562_p10, %p559_p9 }
 0x16c   :  { %567 = shalt.err (!%p564_p11)
}
 0x16d   :  { %s585_s25 = smov 128   ;;  %s586_s26 = smov 8  }
 0x16e   :  { %344 = dma.vmem_to_hbm [thread:$0]  %s339_s1, 256, %s711_s5, [#allocation5], %s585_s25, %s585_s25, %s586_s26  }
 0x16f   :  { %574 = dma.done.wait [#allocation5], 256  }
 0x170   :  { %575 = vsyncadd [#allocation5], 4294967040 }
 0x171   :  { %348 = vsyncpa [#allocation4], 1 }
 0x172   :  { %349 = vsyncpa [#allocation7], 1 }
 0x173   :  { %350 = vsyncpa [#allocation10], 1 }
 0x174   :  { %351 = vsyncpa [#allocation5], 1 }

</bundles_post_ra>
